<compile_context>
chip_gen: v5e
topology: v5e:2x2
jax: 0.10.0
libtpu: 0.0.40
codegen_flags: <defaults>
</compile_context>

<pallas_src>
import jax
import jax.numpy as jnp
from jax.experimental import pallas as pl
from jax.experimental.pallas import tpu as pltpu


def lstm_mlp_kernel(x_ref, wih_row_ref, bias_ref, whh_t_ref,
                    w12_t_ref, b12_ref, w3_t_ref, b3_ref, out_ref):
    # x_ref:       (T, B_pad, 1)  raw inputs, time-major, batch padded
    # wih_row_ref: (1, 4H)        W_ih row (input_size=1); g cols pre-scaled x2
    # bias_ref:    (1, 4H)        b_ih + b_hh;             g cols pre-scaled x2
    # whh_t_ref:   (H, 4H)        W_hh^T;                  g cols pre-scaled x2
    # w12_t_ref:   (H, 8)         (W2 @ W1)^T     b12_ref: (1, 8)
    # w3_t_ref:    (8, 1)         W3^T            b3_ref:  (1, 1)
    T, Bp, _ = x_ref.shape
    H = whh_t_ref.shape[0]

    wih_row = wih_row_ref[...]                                  # (1, 4H)
    bias = bias_ref[...]                                        # (1, 4H)
    whh_t = whh_t_ref[...]                                      # (H, 4H)

    h = jnp.zeros((Bp, H), jnp.float32)
    c = jnp.zeros((Bp, H), jnp.float32)

    # Fully unrolled recurrence (T is a small static trip count).
    for t in range(T):
        x_t = x_ref[t]                                          # (Bp, 1)
        # In-kernel input projection: one VPU broadcast mul + adds.
        gates = x_t * wih_row + bias + jnp.dot(
            h, whh_t, preferred_element_type=jnp.float32)       # (Bp, 4H)
        # Single full-width EUP pass; g recovered via tanh(z) = 2*sig(2z) - 1
        # (the factor 2 was folded into W_hh / W_ih / bias g-columns).
        sig = jax.nn.sigmoid(gates)
        i_g = sig[:, 0 * H:1 * H]
        f_g = sig[:, 1 * H:2 * H]
        g_g = 2.0 * sig[:, 2 * H:3 * H] - 1.0
        o_g = sig[:, 3 * H:4 * H]
        c = f_g * c + i_g * g_g
        h = o_g * jnp.tanh(c)                                   # small (Bp, H)

    # ReLU over LSTM outputs, last timestep == relu(h_T).
    h_relu = jnp.maximum(h, 0.0)
    # Fused fc1+fc2 (no activation between them in the reference module).
    y = jnp.dot(h_relu, w12_t_ref[...],
                preferred_element_type=jnp.float32) + b12_ref[...]   # (Bp, 8)
    y = jnp.maximum(y, 0.0)
    y = jnp.dot(y, w3_t_ref[...],
                preferred_element_type=jnp.float32) + b3_ref[...]    # (Bp, 1)
    out_ref[...] = y


def lstm_forward(x, params):
    """x: (B, T, 1) float32 (batch_first, like the PyTorch module)."""
    B, T, I = x.shape
    H = params["w_hh"].shape[1]
    B_pad = max(8, ((B + 7) // 8) * 8)       # sublane-aligned LHS for the MXU

    # Time-major, batch zero-padded (padded rows never affect real rows).
    x_tm = jnp.transpose(x, (1, 0, 2))                          # (T, B, 1)
    x_tm = jnp.pad(x_tm, ((0, 0), (0, B_pad - B), (0, 0)))      # (T, B_pad, 1)

    # Gate ordering is PyTorch's (i, f, g, o).  Pre-scale the g block by 2 so
    # the kernel can use tanh(z) = 2*sigmoid(2z) - 1 with a single sigmoid.
    scale = jnp.ones((4 * H,), jnp.float32).at[2 * H:3 * H].set(2.0)
    wih_row = (params["w_ih"][:, 0] * scale).reshape(1, 4 * H)  # (1, 4H)
    bias_row = ((params["b_ih"] + params["b_hh"]) * scale).reshape(1, 4 * H)
    whh_t = (params["w_hh"] * scale[:, None]).T                 # (H, 4H)

    # Fuse fc1/fc2 offline: y = (x @ W1^T + b1) @ W2^T + b2 = x @ (W2@W1)^T + ...
    # (valid because the reference module has no nonlinearity between fc1/fc2).
    w12 = params["w2"] @ params["w1"]                           # (8, 32)
    b12 = params["w2"] @ params["b1"] + params["b2"]            # (8,)

    args = (x_tm.astype(jnp.float32),
            wih_row,
            bias_row,
            whh_t,
            w12.T,                      # (32, 8)
            b12.reshape(1, -1),         # (1, 8)
            params["w3"].T,             # (8, 1)
            params["b3"].reshape(1, -1))

    vmem = pl.BlockSpec(memory_space=pltpu.MemorySpace.VMEM)
    out = pl.pallas_call(
        lstm_mlp_kernel,
        out_shape=jax.ShapeDtypeStruct((B_pad, 1), jnp.float32),
        in_specs=[vmem] * len(args),
        out_specs=vmem,
    )(*args)
    return out[:B]


def init_params(key, input_size=1, hidden=32):
    k = 1.0 / jnp.sqrt(hidden)
    keys = jax.random.split(key, 10)
    u = lambda kk, shape, bound: jax.random.uniform(
        kk, shape, jnp.float32, -bound, bound)
    return {
        "w_ih": u(keys[0], (4 * hidden, input_size), k),
        "w_hh": u(keys[1], (4 * hidden, hidden), k),
        "b_ih": u(keys[2], (4 * hidden,), k),
        "b_hh": u(keys[3], (4 * hidden,), k),
        "w1": u(keys[4], (16, 32), 1.0 / jnp.sqrt(32.0)),
        "b1": u(keys[5], (16,), 1.0 / jnp.sqrt(32.0)),
        "w2": u(keys[6], (8, 16), 1.0 / jnp.sqrt(16.0)),
        "b2": u(keys[7], (8,), 1.0 / jnp.sqrt(16.0)),
        "w3": u(keys[8], (1, 8), 1.0 / jnp.sqrt(8.0)),
        "b3": u(keys[9], (1,), 1.0 / jnp.sqrt(8.0)),
    }


if __name__ == "__main__":
    key = jax.random.PRNGKey(0)
    k_x, k_p = jax.random.split(key)

    B, T, I = 2, 8, 1                       # batch=2, seq=8, input_size=1
    x = jax.random.normal(k_x, (B, T, I), jnp.float32)
    params = init_params(k_p, input_size=I, hidden=32)

    out = lstm_forward(x, params)
    jax.block_until_ready(out)
    assert out.shape == (B, 1), out.shape
    print("KERNEL_OK")
</pallas_src>

<mosaic_0001>
module attributes {stable_mosaic.version = 11 : i64} {
  func.func @lstm_mlp_kernel(%arg0: memref<8x8x1xf32, #tpu.memory_space<vmem>>, %arg1: memref<1x128xf32, #tpu.memory_space<vmem>>, %arg2: memref<1x128xf32, #tpu.memory_space<vmem>>, %arg3: memref<32x128xf32, #tpu.memory_space<vmem>>, %arg4: memref<32x8xf32, #tpu.memory_space<vmem>>, %arg5: memref<1x8xf32, #tpu.memory_space<vmem>>, %arg6: memref<8x1xf32, #tpu.memory_space<vmem>>, %arg7: memref<1x1xf32, #tpu.memory_space<vmem>>, %arg8: memref<8x1xf32, #tpu.memory_space<vmem>>) attributes {dimension_semantics = [], scalar_prefetch = 0 : i64, scratch_operands = 0 : i64, tpu.core_type = #tpu.core_type<tc>} {
    %c0 = arith.constant 0 : index
    %c0_0 = arith.constant 0 : index
    %0 = vector.load %arg1[%c0, %c0_0] : memref<1x128xf32, #tpu.memory_space<vmem>>, vector<1x128xf32>
    %c0_1 = arith.constant 0 : index
    %c0_2 = arith.constant 0 : index
    %1 = vector.load %arg2[%c0_1, %c0_2] : memref<1x128xf32, #tpu.memory_space<vmem>>, vector<1x128xf32>
    %c0_3 = arith.constant 0 : index
    %c0_4 = arith.constant 0 : index
    %2 = vector.load %arg3[%c0_3, %c0_4] : memref<32x128xf32, #tpu.memory_space<vmem>>, vector<32x128xf32>
    %cst = arith.constant 0.000000e+00 : f32
    %3 = vector.broadcast %cst : f32 to vector<8x32xf32>
    %cst_5 = arith.constant 0.000000e+00 : f32
    %4 = vector.broadcast %cst_5 : f32 to vector<8x32xf32>
    %c0_6 = arith.constant 0 : index
    %c0_7 = arith.constant 0 : index
    %c0_8 = arith.constant 0 : index
    %5 = vector.load %arg0[%c0_6, %c0_7, %c0_8] : memref<8x8x1xf32, #tpu.memory_space<vmem>>, vector<1x8x1xf32>
    %6 = vector.shape_cast %5 : vector<1x8x1xf32> to vector<8x1xf32>
    %7 = vector.broadcast %6 : vector<8x1xf32> to vector<8x128xf32>
    %8 = vector.broadcast %0 : vector<1x128xf32> to vector<8x128xf32>
    %9 = arith.mulf %7, %8 : vector<8x128xf32>
    %10 = vector.broadcast %1 : vector<1x128xf32> to vector<8x128xf32>
    %11 = arith.addf %9, %10 : vector<8x128xf32>
    %cst_9 = arith.constant dense<0.000000e+00> : vector<8x128xf32>
    %12 = tpu.matmul %3, %2, %cst_9 {dimension_numbers = #tpu.dot_dimension_numbers<[1], [0], [0], [1], [0, 0, 1, 1], [], []>} : vector<8x32xf32>, vector<32x128xf32>, vector<8x128xf32> -> vector<8x128xf32>
    %13 = arith.addf %11, %12 : vector<8x128xf32>
    %14 = arith.negf %13 : vector<8x128xf32>
    %15 = math.exp %14 : vector<8x128xf32>
    %cst_10 = arith.constant 1.000000e+00 : f32
    %16 = vector.broadcast %cst_10 : f32 to vector<8x128xf32>
    %17 = arith.addf %16, %15 : vector<8x128xf32>
    %18 = arith.divf %16, %17 : vector<8x128xf32>
    %19 = vector.extract_strided_slice %18 {offsets = [0, 0], sizes = [8, 32], strides = [1, 1]} : vector<8x128xf32> to vector<8x32xf32>
    %20 = vector.extract_strided_slice %18 {offsets = [0, 32], sizes = [8, 32], strides = [1, 1]} : vector<8x128xf32> to vector<8x32xf32>
    %21 = vector.extract_strided_slice %18 {offsets = [0, 64], sizes = [8, 32], strides = [1, 1]} : vector<8x128xf32> to vector<8x32xf32>
    %cst_11 = arith.constant 2.000000e+00 : f32
    %22 = vector.broadcast %cst_11 : f32 to vector<8x32xf32>
    %23 = arith.mulf %22, %21 : vector<8x32xf32>
    %cst_12 = arith.constant 1.000000e+00 : f32
    %24 = vector.broadcast %cst_12 : f32 to vector<8x32xf32>
    %25 = arith.subf %23, %24 : vector<8x32xf32>
    %26 = vector.extract_strided_slice %18 {offsets = [0, 96], sizes = [8, 32], strides = [1, 1]} : vector<8x128xf32> to vector<8x32xf32>
    %27 = arith.mulf %20, %4 : vector<8x32xf32>
    %28 = arith.mulf %19, %25 : vector<8x32xf32>
    %29 = arith.addf %27, %28 : vector<8x32xf32>
    %30 = math.tanh %29 : vector<8x32xf32>
    %31 = arith.mulf %26, %30 : vector<8x32xf32>
    %c1 = arith.constant 1 : index
    %c0_13 = arith.constant 0 : index
    %c0_14 = arith.constant 0 : index
    %32 = vector.load %arg0[%c1, %c0_13, %c0_14] : memref<8x8x1xf32, #tpu.memory_space<vmem>>, vector<1x8x1xf32>
    %33 = vector.shape_cast %32 : vector<1x8x1xf32> to vector<8x1xf32>
    %34 = vector.broadcast %33 : vector<8x1xf32> to vector<8x128xf32>
    %35 = vector.broadcast %0 : vector<1x128xf32> to vector<8x128xf32>
    %36 = arith.mulf %34, %35 : vector<8x128xf32>
    %37 = vector.broadcast %1 : vector<1x128xf32> to vector<8x128xf32>
    %38 = arith.addf %36, %37 : vector<8x128xf32>
    %cst_15 = arith.constant dense<0.000000e+00> : vector<8x128xf32>
    %39 = tpu.matmul %31, %2, %cst_15 {dimension_numbers = #tpu.dot_dimension_numbers<[1], [0], [0], [1], [0, 0, 1, 1], [], []>} : vector<8x32xf32>, vector<32x128xf32>, vector<8x128xf32> -> vector<8x128xf32>
    %40 = arith.addf %38, %39 : vector<8x128xf32>
    %41 = arith.negf %40 : vector<8x128xf32>
    %42 = math.exp %41 : vector<8x128xf32>
    %cst_16 = arith.constant 1.000000e+00 : f32
    %43 = vector.broadcast %cst_16 : f32 to vector<8x128xf32>
    %44 = arith.addf %43, %42 : vector<8x128xf32>
    %45 = arith.divf %43, %44 : vector<8x128xf32>
    %46 = vector.extract_strided_slice %45 {offsets = [0, 0], sizes = [8, 32], strides = [1, 1]} : vector<8x128xf32> to vector<8x32xf32>
    %47 = vector.extract_strided_slice %45 {offsets = [0, 32], sizes = [8, 32], strides = [1, 1]} : vector<8x128xf32> to vector<8x32xf32>
    %48 = vector.extract_strided_slice %45 {offsets = [0, 64], sizes = [8, 32], strides = [1, 1]} : vector<8x128xf32> to vector<8x32xf32>
    %cst_17 = arith.constant 2.000000e+00 : f32
    %49 = vector.broadcast %cst_17 : f32 to vector<8x32xf32>
    %50 = arith.mulf %49, %48 : vector<8x32xf32>
    %cst_18 = arith.constant 1.000000e+00 : f32
    %51 = vector.broadcast %cst_18 : f32 to vector<8x32xf32>
    %52 = arith.subf %50, %51 : vector<8x32xf32>
    %53 = vector.extract_strided_slice %45 {offsets = [0, 96], sizes = [8, 32], strides = [1, 1]} : vector<8x128xf32> to vector<8x32xf32>
    %54 = arith.mulf %47, %29 : vector<8x32xf32>
    %55 = arith.mulf %46, %52 : vector<8x32xf32>
    %56 = arith.addf %54, %55 : vector<8x32xf32>
    %57 = math.tanh %56 : vector<8x32xf32>
    %58 = arith.mulf %53, %57 : vector<8x32xf32>
    %c2 = arith.constant 2 : index
    %c0_19 = arith.constant 0 : index
    %c0_20 = arith.constant 0 : index
    %59 = vector.load %arg0[%c2, %c0_19, %c0_20] : memref<8x8x1xf32, #tpu.memory_space<vmem>>, vector<1x8x1xf32>
    %60 = vector.shape_cast %59 : vector<1x8x1xf32> to vector<8x1xf32>
    %61 = vector.broadcast %60 : vector<8x1xf32> to vector<8x128xf32>
    %62 = vector.broadcast %0 : vector<1x128xf32> to vector<8x128xf32>
    %63 = arith.mulf %61, %62 : vector<8x128xf32>
    %64 = vector.broadcast %1 : vector<1x128xf32> to vector<8x128xf32>
    %65 = arith.addf %63, %64 : vector<8x128xf32>
    %cst_21 = arith.constant dense<0.000000e+00> : vector<8x128xf32>
    %66 = tpu.matmul %58, %2, %cst_21 {dimension_numbers = #tpu.dot_dimension_numbers<[1], [0], [0], [1], [0, 0, 1, 1], [], []>} : vector<8x32xf32>, vector<32x128xf32>, vector<8x128xf32> -> vector<8x128xf32>
    %67 = arith.addf %65, %66 : vector<8x128xf32>
    %68 = arith.negf %67 : vector<8x128xf32>
    %69 = math.exp %68 : vector<8x128xf32>
    %cst_22 = arith.constant 1.000000e+00 : f32
    %70 = vector.broadcast %cst_22 : f32 to vector<8x128xf32>
    %71 = arith.addf %70, %69 : vector<8x128xf32>
    %72 = arith.divf %70, %71 : vector<8x128xf32>
    %73 = vector.extract_strided_slice %72 {offsets = [0, 0], sizes = [8, 32], strides = [1, 1]} : vector<8x128xf32> to vector<8x32xf32>
    %74 = vector.extract_strided_slice %72 {offsets = [0, 32], sizes = [8, 32], strides = [1, 1]} : vector<8x128xf32> to vector<8x32xf32>
    %75 = vector.extract_strided_slice %72 {offsets = [0, 64], sizes = [8, 32], strides = [1, 1]} : vector<8x128xf32> to vector<8x32xf32>
    %cst_23 = arith.constant 2.000000e+00 : f32
    %76 = vector.broadcast %cst_23 : f32 to vector<8x32xf32>
    %77 = arith.mulf %76, %75 : vector<8x32xf32>
    %cst_24 = arith.constant 1.000000e+00 : f32
    %78 = vector.broadcast %cst_24 : f32 to vector<8x32xf32>
    %79 = arith.subf %77, %78 : vector<8x32xf32>
    %80 = vector.extract_strided_slice %72 {offsets = [0, 96], sizes = [8, 32], strides = [1, 1]} : vector<8x128xf32> to vector<8x32xf32>
    %81 = arith.mulf %74, %56 : vector<8x32xf32>
    %82 = arith.mulf %73, %79 : vector<8x32xf32>
    %83 = arith.addf %81, %82 : vector<8x32xf32>
    %84 = math.tanh %83 : vector<8x32xf32>
    %85 = arith.mulf %80, %84 : vector<8x32xf32>
    %c3 = arith.constant 3 : index
    %c0_25 = arith.constant 0 : index
    %c0_26 = arith.constant 0 : index
    %86 = vector.load %arg0[%c3, %c0_25, %c0_26] : memref<8x8x1xf32, #tpu.memory_space<vmem>>, vector<1x8x1xf32>
    %87 = vector.shape_cast %86 : vector<1x8x1xf32> to vector<8x1xf32>
    %88 = vector.broadcast %87 : vector<8x1xf32> to vector<8x128xf32>
    %89 = vector.broadcast %0 : vector<1x128xf32> to vector<8x128xf32>
    %90 = arith.mulf %88, %89 : vector<8x128xf32>
    %91 = vector.broadcast %1 : vector<1x128xf32> to vector<8x128xf32>
    %92 = arith.addf %90, %91 : vector<8x128xf32>
    %cst_27 = arith.constant dense<0.000000e+00> : vector<8x128xf32>
    %93 = tpu.matmul %85, %2, %cst_27 {dimension_numbers = #tpu.dot_dimension_numbers<[1], [0], [0], [1], [0, 0, 1, 1], [], []>} : vector<8x32xf32>, vector<32x128xf32>, vector<8x128xf32> -> vector<8x128xf32>
    %94 = arith.addf %92, %93 : vector<8x128xf32>
    %95 = arith.negf %94 : vector<8x128xf32>
    %96 = math.exp %95 : vector<8x128xf32>
    %cst_28 = arith.constant 1.000000e+00 : f32
    %97 = vector.broadcast %cst_28 : f32 to vector<8x128xf32>
    %98 = arith.addf %97, %96 : vector<8x128xf32>
    %99 = arith.divf %97, %98 : vector<8x128xf32>
    %100 = vector.extract_strided_slice %99 {offsets = [0, 0], sizes = [8, 32], strides = [1, 1]} : vector<8x128xf32> to vector<8x32xf32>
    %101 = vector.extract_strided_slice %99 {offsets = [0, 32], sizes = [8, 32], strides = [1, 1]} : vector<8x128xf32> to vector<8x32xf32>
    %102 = vector.extract_strided_slice %99 {offsets = [0, 64], sizes = [8, 32], strides = [1, 1]} : vector<8x128xf32> to vector<8x32xf32>
    %cst_29 = arith.constant 2.000000e+00 : f32
    %103 = vector.broadcast %cst_29 : f32 to vector<8x32xf32>
    %104 = arith.mulf %103, %102 : vector<8x32xf32>
    %cst_30 = arith.constant 1.000000e+00 : f32
    %105 = vector.broadcast %cst_30 : f32 to vector<8x32xf32>
    %106 = arith.subf %104, %105 : vector<8x32xf32>
    %107 = vector.extract_strided_slice %99 {offsets = [0, 96], sizes = [8, 32], strides = [1, 1]} : vector<8x128xf32> to vector<8x32xf32>
    %108 = arith.mulf %101, %83 : vector<8x32xf32>
    %109 = arith.mulf %100, %106 : vector<8x32xf32>
    %110 = arith.addf %108, %109 : vector<8x32xf32>
    %111 = math.tanh %110 : vector<8x32xf32>
    %112 = arith.mulf %107, %111 : vector<8x32xf32>
    %c4 = arith.constant 4 : index
    %c0_31 = arith.constant 0 : index
    %c0_32 = arith.constant 0 : index
    %113 = vector.load %arg0[%c4, %c0_31, %c0_32] : memref<8x8x1xf32, #tpu.memory_space<vmem>>, vector<1x8x1xf32>
    %114 = vector.shape_cast %113 : vector<1x8x1xf32> to vector<8x1xf32>
    %115 = vector.broadcast %114 : vector<8x1xf32> to vector<8x128xf32>
    %116 = vector.broadcast %0 : vector<1x128xf32> to vector<8x128xf32>
    %117 = arith.mulf %115, %116 : vector<8x128xf32>
    %118 = vector.broadcast %1 : vector<1x128xf32> to vector<8x128xf32>
    %119 = arith.addf %117, %118 : vector<8x128xf32>
    %cst_33 = arith.constant dense<0.000000e+00> : vector<8x128xf32>
    %120 = tpu.matmul %112, %2, %cst_33 {dimension_numbers = #tpu.dot_dimension_numbers<[1], [0], [0], [1], [0, 0, 1, 1], [], []>} : vector<8x32xf32>, vector<32x128xf32>, vector<8x128xf32> -> vector<8x128xf32>
    %121 = arith.addf %119, %120 : vector<8x128xf32>
    %122 = arith.negf %121 : vector<8x128xf32>
    %123 = math.exp %122 : vector<8x128xf32>
    %cst_34 = arith.constant 1.000000e+00 : f32
    %124 = vector.broadcast %cst_34 : f32 to vector<8x128xf32>
    %125 = arith.addf %124, %123 : vector<8x128xf32>
    %126 = arith.divf %124, %125 : vector<8x128xf32>
    %127 = vector.extract_strided_slice %126 {offsets = [0, 0], sizes = [8, 32], strides = [1, 1]} : vector<8x128xf32> to vector<8x32xf32>
    %128 = vector.extract_strided_slice %126 {offsets = [0, 32], sizes = [8, 32], strides = [1, 1]} : vector<8x128xf32> to vector<8x32xf32>
    %129 = vector.extract_strided_slice %126 {offsets = [0, 64], sizes = [8, 32], strides = [1, 1]} : vector<8x128xf32> to vector<8x32xf32>
    %cst_35 = arith.constant 2.000000e+00 : f32
    %130 = vector.broadcast %cst_35 : f32 to vector<8x32xf32>
    %131 = arith.mulf %130, %129 : vector<8x32xf32>
    %cst_36 = arith.constant 1.000000e+00 : f32
    %132 = vector.broadcast %cst_36 : f32 to vector<8x32xf32>
    %133 = arith.subf %131, %132 : vector<8x32xf32>
    %134 = vector.extract_strided_slice %126 {offsets = [0, 96], sizes = [8, 32], strides = [1, 1]} : vector<8x128xf32> to vector<8x32xf32>
    %135 = arith.mulf %128, %110 : vector<8x32xf32>
    %136 = arith.mulf %127, %133 : vector<8x32xf32>
    %137 = arith.addf %135, %136 : vector<8x32xf32>
    %138 = math.tanh %137 : vector<8x32xf32>
    %139 = arith.mulf %134, %138 : vector<8x32xf32>
    %c5 = arith.constant 5 : index
    %c0_37 = arith.constant 0 : index
    %c0_38 = arith.constant 0 : index
    %140 = vector.load %arg0[%c5, %c0_37, %c0_38] : memref<8x8x1xf32, #tpu.memory_space<vmem>>, vector<1x8x1xf32>
    %141 = vector.shape_cast %140 : vector<1x8x1xf32> to vector<8x1xf32>
    %142 = vector.broadcast %141 : vector<8x1xf32> to vector<8x128xf32>
    %143 = vector.broadcast %0 : vector<1x128xf32> to vector<8x128xf32>
    %144 = arith.mulf %142, %143 : vector<8x128xf32>
    %145 = vector.broadcast %1 : vector<1x128xf32> to vector<8x128xf32>
    %146 = arith.addf %144, %145 : vector<8x128xf32>
    %cst_39 = arith.constant dense<0.000000e+00> : vector<8x128xf32>
    %147 = tpu.matmul %139, %2, %cst_39 {dimension_numbers = #tpu.dot_dimension_numbers<[1], [0], [0], [1], [0, 0, 1, 1], [], []>} : vector<8x32xf32>, vector<32x128xf32>, vector<8x128xf32> -> vector<8x128xf32>
    %148 = arith.addf %146, %147 : vector<8x128xf32>
    %149 = arith.negf %148 : vector<8x128xf32>
    %150 = math.exp %149 : vector<8x128xf32>
    %cst_40 = arith.constant 1.000000e+00 : f32
    %151 = vector.broadcast %cst_40 : f32 to vector<8x128xf32>
    %152 = arith.addf %151, %150 : vector<8x128xf32>
    %153 = arith.divf %151, %152 : vector<8x128xf32>
    %154 = vector.extract_strided_slice %153 {offsets = [0, 0], sizes = [8, 32], strides = [1, 1]} : vector<8x128xf32> to vector<8x32xf32>
    %155 = vector.extract_strided_slice %153 {offsets = [0, 32], sizes = [8, 32], strides = [1, 1]} : vector<8x128xf32> to vector<8x32xf32>
    %156 = vector.extract_strided_slice %153 {offsets = [0, 64], sizes = [8, 32], strides = [1, 1]} : vector<8x128xf32> to vector<8x32xf32>
    %cst_41 = arith.constant 2.000000e+00 : f32
    %157 = vector.broadcast %cst_41 : f32 to vector<8x32xf32>
    %158 = arith.mulf %157, %156 : vector<8x32xf32>
    %cst_42 = arith.constant 1.000000e+00 : f32
    %159 = vector.broadcast %cst_42 : f32 to vector<8x32xf32>
    %160 = arith.subf %158, %159 : vector<8x32xf32>
    %161 = vector.extract_strided_slice %153 {offsets = [0, 96], sizes = [8, 32], strides = [1, 1]} : vector<8x128xf32> to vector<8x32xf32>
    %162 = arith.mulf %155, %137 : vector<8x32xf32>
    %163 = arith.mulf %154, %160 : vector<8x32xf32>
    %164 = arith.addf %162, %163 : vector<8x32xf32>
    %165 = math.tanh %164 : vector<8x32xf32>
    %166 = arith.mulf %161, %165 : vector<8x32xf32>
    %c6 = arith.constant 6 : index
    %c0_43 = arith.constant 0 : index
    %c0_44 = arith.constant 0 : index
    %167 = vector.load %arg0[%c6, %c0_43, %c0_44] : memref<8x8x1xf32, #tpu.memory_space<vmem>>, vector<1x8x1xf32>
    %168 = vector.shape_cast %167 : vector<1x8x1xf32> to vector<8x1xf32>
    %169 = vector.broadcast %168 : vector<8x1xf32> to vector<8x128xf32>
    %170 = vector.broadcast %0 : vector<1x128xf32> to vector<8x128xf32>
    %171 = arith.mulf %169, %170 : vector<8x128xf32>
    %172 = vector.broadcast %1 : vector<1x128xf32> to vector<8x128xf32>
    %173 = arith.addf %171, %172 : vector<8x128xf32>
    %cst_45 = arith.constant dense<0.000000e+00> : vector<8x128xf32>
    %174 = tpu.matmul %166, %2, %cst_45 {dimension_numbers = #tpu.dot_dimension_numbers<[1], [0], [0], [1], [0, 0, 1, 1], [], []>} : vector<8x32xf32>, vector<32x128xf32>, vector<8x128xf32> -> vector<8x128xf32>
    %175 = arith.addf %173, %174 : vector<8x128xf32>
    %176 = arith.negf %175 : vector<8x128xf32>
    %177 = math.exp %176 : vector<8x128xf32>
    %cst_46 = arith.constant 1.000000e+00 : f32
    %178 = vector.broadcast %cst_46 : f32 to vector<8x128xf32>
    %179 = arith.addf %178, %177 : vector<8x128xf32>
    %180 = arith.divf %178, %179 : vector<8x128xf32>
    %181 = vector.extract_strided_slice %180 {offsets = [0, 0], sizes = [8, 32], strides = [1, 1]} : vector<8x128xf32> to vector<8x32xf32>
    %182 = vector.extract_strided_slice %180 {offsets = [0, 32], sizes = [8, 32], strides = [1, 1]} : vector<8x128xf32> to vector<8x32xf32>
    %183 = vector.extract_strided_slice %180 {offsets = [0, 64], sizes = [8, 32], strides = [1, 1]} : vector<8x128xf32> to vector<8x32xf32>
    %cst_47 = arith.constant 2.000000e+00 : f32
    %184 = vector.broadcast %cst_47 : f32 to vector<8x32xf32>
    %185 = arith.mulf %184, %183 : vector<8x32xf32>
    %cst_48 = arith.constant 1.000000e+00 : f32
    %186 = vector.broadcast %cst_48 : f32 to vector<8x32xf32>
    %187 = arith.subf %185, %186 : vector<8x32xf32>
    %188 = vector.extract_strided_slice %180 {offsets = [0, 96], sizes = [8, 32], strides = [1, 1]} : vector<8x128xf32> to vector<8x32xf32>
    %189 = arith.mulf %182, %164 : vector<8x32xf32>
    %190 = arith.mulf %181, %187 : vector<8x32xf32>
    %191 = arith.addf %189, %190 : vector<8x32xf32>
    %192 = math.tanh %191 : vector<8x32xf32>
    %193 = arith.mulf %188, %192 : vector<8x32xf32>
    %c7 = arith.constant 7 : index
    %c0_49 = arith.constant 0 : index
    %c0_50 = arith.constant 0 : index
    %194 = vector.load %arg0[%c7, %c0_49, %c0_50] : memref<8x8x1xf32, #tpu.memory_space<vmem>>, vector<1x8x1xf32>
    %195 = vector.shape_cast %194 : vector<1x8x1xf32> to vector<8x1xf32>
    %196 = vector.broadcast %195 : vector<8x1xf32> to vector<8x128xf32>
    %197 = vector.broadcast %0 : vector<1x128xf32> to vector<8x128xf32>
    %198 = arith.mulf %196, %197 : vector<8x128xf32>
    %199 = vector.broadcast %1 : vector<1x128xf32> to vector<8x128xf32>
    %200 = arith.addf %198, %199 : vector<8x128xf32>
    %cst_51 = arith.constant dense<0.000000e+00> : vector<8x128xf32>
    %201 = tpu.matmul %193, %2, %cst_51 {dimension_numbers = #tpu.dot_dimension_numbers<[1], [0], [0], [1], [0, 0, 1, 1], [], []>} : vector<8x32xf32>, vector<32x128xf32>, vector<8x128xf32> -> vector<8x128xf32>
    %202 = arith.addf %200, %201 : vector<8x128xf32>
    %203 = arith.negf %202 : vector<8x128xf32>
    %204 = math.exp %203 : vector<8x128xf32>
    %cst_52 = arith.constant 1.000000e+00 : f32
    %205 = vector.broadcast %cst_52 : f32 to vector<8x128xf32>
    %206 = arith.addf %205, %204 : vector<8x128xf32>
    %207 = arith.divf %205, %206 : vector<8x128xf32>
    %208 = vector.extract_strided_slice %207 {offsets = [0, 0], sizes = [8, 32], strides = [1, 1]} : vector<8x128xf32> to vector<8x32xf32>
    %209 = vector.extract_strided_slice %207 {offsets = [0, 32], sizes = [8, 32], strides = [1, 1]} : vector<8x128xf32> to vector<8x32xf32>
    %210 = vector.extract_strided_slice %207 {offsets = [0, 64], sizes = [8, 32], strides = [1, 1]} : vector<8x128xf32> to vector<8x32xf32>
    %cst_53 = arith.constant 2.000000e+00 : f32
    %211 = vector.broadcast %cst_53 : f32 to vector<8x32xf32>
    %212 = arith.mulf %211, %210 : vector<8x32xf32>
    %cst_54 = arith.constant 1.000000e+00 : f32
    %213 = vector.broadcast %cst_54 : f32 to vector<8x32xf32>
    %214 = arith.subf %212, %213 : vector<8x32xf32>
    %215 = vector.extract_strided_slice %207 {offsets = [0, 96], sizes = [8, 32], strides = [1, 1]} : vector<8x128xf32> to vector<8x32xf32>
    %216 = arith.mulf %209, %191 : vector<8x32xf32>
    %217 = arith.mulf %208, %214 : vector<8x32xf32>
    %218 = arith.addf %216, %217 : vector<8x32xf32>
    %219 = math.tanh %218 : vector<8x32xf32>
    %220 = arith.mulf %215, %219 : vector<8x32xf32>
    %cst_55 = arith.constant 0.000000e+00 : f32
    %221 = vector.broadcast %cst_55 : f32 to vector<8x32xf32>
    %222 = arith.maximumf %220, %221 : vector<8x32xf32>
    %c0_56 = arith.constant 0 : index
    %c0_57 = arith.constant 0 : index
    %223 = vector.load %arg4[%c0_56, %c0_57] : memref<32x8xf32, #tpu.memory_space<vmem>>, vector<32x8xf32>
    %cst_58 = arith.constant dense<0.000000e+00> : vector<8x8xf32>
    %224 = tpu.matmul %222, %223, %cst_58 {dimension_numbers = #tpu.dot_dimension_numbers<[1], [0], [0], [1], [0, 0, 1, 1], [], []>} : vector<8x32xf32>, vector<32x8xf32>, vector<8x8xf32> -> vector<8x8xf32>
    %c0_59 = arith.constant 0 : index
    %c0_60 = arith.constant 0 : index
    %225 = vector.load %arg5[%c0_59, %c0_60] : memref<1x8xf32, #tpu.memory_space<vmem>>, vector<1x8xf32>
    %226 = vector.broadcast %225 : vector<1x8xf32> to vector<8x8xf32>
    %227 = arith.addf %224, %226 : vector<8x8xf32>
    %cst_61 = arith.constant 0.000000e+00 : f32
    %228 = vector.broadcast %cst_61 : f32 to vector<8x8xf32>
    %229 = arith.maximumf %227, %228 : vector<8x8xf32>
    %c0_62 = arith.constant 0 : index
    %c0_63 = arith.constant 0 : index
    %230 = vector.load %arg6[%c0_62, %c0_63] : memref<8x1xf32, #tpu.memory_space<vmem>>, vector<8x1xf32>
    %cst_64 = arith.constant dense<0.000000e+00> : vector<8x1xf32>
    %231 = tpu.matmul %229, %230, %cst_64 {dimension_numbers = #tpu.dot_dimension_numbers<[1], [0], [0], [1], [0, 0, 1, 1], [], []>} : vector<8x8xf32>, vector<8x1xf32>, vector<8x1xf32> -> vector<8x1xf32>
    %c0_65 = arith.constant 0 : index
    %c0_66 = arith.constant 0 : index
    %232 = vector.load %arg7[%c0_65, %c0_66] : memref<1x1xf32, #tpu.memory_space<vmem>>, vector<1x1xf32>
    %233 = vector.broadcast %232 : vector<1x1xf32> to vector<8x1xf32>
    %234 = arith.addf %231, %233 : vector<8x1xf32>
    %c0_67 = arith.constant 0 : index
    %c0_68 = arith.constant 0 : index
    %235 = vector.load %arg8[%c0_67, %c0_68] : memref<8x1xf32, #tpu.memory_space<vmem>>, vector<8x1xf32>
    tpu.vector_store %arg8[%c0_67, %c0_68], %234 {strides = array<i32>} : memref<8x1xf32, #tpu.memory_space<vmem>>, vector<8x1xf32>,
    return
  }
}

</mosaic_0001>

<bundles_post_ra>
// kernel: tpu_custom_call.1
= control target key start
LH: loop header
LB: loop body
LE: loop exit
PB: predicated region body
PF: predicated region fallthrough
CT: control target
= control target key end

     0   :  { %v786_v2 = vmov 0   ;;  %v787_v6 = vmov 0.0   ;;  %vm51_vm4 = vcmask 261120   ;;  %s961_s3 = inlined_call_operand.vmem [shape: f32[32,128], index: 3, kind: input, shape index: {}]   ;;  %s962_s0 = inlined_call_operand.vmem [shape: f32[8,8,1], index: 0, kind: input, shape index: {}]   ;;  %s963_s1 = inlined_call_operand.vmem [shape: f32[1,128], index: 1, kind: input, shape index: {}]   ;;  %s964_s2 = inlined_call_operand.vmem [shape: f32[1,128], index: 2, kind: input, shape index: {}]   ;;  %s965_s4 = inlined_call_operand.vmem [shape: f32[32,8], index: 4, kind: input, shape index: {}]   ;;  %s966_s5 = inlined_call_operand.vmem [shape: f32[1,8], index: 5, kind: input, shape index: {}]   ;;  %s967_s6 = inlined_call_operand.vmem [shape: f32[8,1], index: 6, kind: input, shape index: {}]   ;;  %s968_s7 = inlined_call_operand.<no memory space> [shape: f32[1,1], index: 7, kind: input, shape index: {}]   ;;  %s969_s8 = inlined_call_operand.vmem [shape: f32[8,1], index: 8, kind: output, shape index: {}]  }
   0x1   :  { %v36_v0 = vld [vmem:[%s961_s3 + $0x18] sm:$0xff]  ;;  %v35_v1 = vld [vmem:[%s961_s3 + $0x10] sm:$0xff]  ;;  %731 = vset.pattern.permute.xlu0 %v786_v2  ;;  %732 = vset.pattern.permute.xlu2 %v786_v2  ;;  %v37_v3 = vld [vmem:[%s962_s0] sm:$0xff] }
   0x2   :  { %67 = vmatpush.msra.mxu0 %v36_v0  ;;  %140 = vmatpush.msra.mxu1 %v36_v0  ;;  %v34_v4 = vld [vmem:[%s961_s3 + $0x8] sm:$0xff]  ;;  %v33_v5 = vld [vmem:[%s961_s3] sm:$0xff] }
   0x3   :  { %40 = vperm.xlu0 %731, %v37_v3   ;;  %213 = vmatpush.msra.mxu2 %v36_v0  ;;  %v853_v7 = vld [vmem:[%s963_s1] ss:$0 sm:$0xff]  ;;  %s788_s1 = smov 64   ;;  %v697_v37 = vld [vmem:[%s962_s0 + $0x8] sm:$0xff]  ;;  %v701_v3 = vld [vmem:[%s962_s0 + $0x10] sm:$0xff] }
   0x4   :  { %68 = vmatpush.msra.mxu0 %v35_v1  ;;  %141 = vmatpush.msra.mxu1 %v35_v1  ;;  %v859_v10 = vld [vmem:[%s964_s2] ss:$0 sm:$0xff]  ;;  %s789_s2 = smov 32  }
   0x5   :  { %214 = vmatpush.msra.mxu2 %v35_v1  ;;  %733 = vset.pattern.permute.xlu1 %v786_v2 }
   0x6   :  { %69 = vmatpush.msra.mxu0 %v34_v4  ;;  %142 = vmatpush.msra.mxu1 %v34_v4 }
   0x7   :  { %215 = vmatpush.msra.mxu2 %v34_v4  ;;  %286 = vmatpush.msra.mxu3 %v36_v0 }
   0x8   :  { %70 = vmatpush.msra.mxu0 %v33_v5  ;;  %143 = vmatpush.msra.mxu1 %v33_v5 }
   0x9   :  { %71 = vmatmul.f32.vlgmr.msra.gmra.mxu0 %v787_v6  ;;  %216 = vmatpush.msra.mxu2 %v33_v5 }
   0xa   :  { %287 = vmatpush.msra.mxu3 %v35_v1  ;;  %359 = vmatpush.msrb.mxu0 %v36_v0 }
   0xb   :  { %432 = vmatpush.msrb.mxu1 %v36_v0  ;;  %505 = vmatpush.msrb.mxu2 %v36_v0 }
   0xc   :  { %288 = vmatpush.msra.mxu3 %v34_v4  ;;  %360 = vmatpush.msrb.mxu0 %v35_v1 }
   0xd   :  { %433 = vmatpush.msrb.mxu1 %v35_v1  ;;  %506 = vmatpush.msrb.mxu2 %v35_v1 }
   0xe   :  { %289 = vmatpush.msra.mxu3 %v33_v5  ;;  %361 = vmatpush.msrb.mxu0 %v34_v4 }
   0xf   :  { %434 = vmatpush.msrb.mxu1 %v34_v4  ;;  %507 = vmatpush.msrb.mxu2 %v34_v4 }
  0x10   :  { %362 = vmatpush.msrb.mxu0 %v33_v5  ;;  %578 = vmatpush.msrb.mxu3 %v36_v0 }
  0x11   :  { %435 = vmatpush.msrb.mxu1 %v33_v5  ;;  %508 = vmatpush.msrb.mxu2 %v33_v5 }
  0x12   :  { %579 = vmatpush.msrb.mxu3 %v35_v1 }
  0x14   :  { %580 = vmatpush.msrb.mxu3 %v34_v4 }
  0x16   :  { %581 = vmatpush.msrb.mxu3 %v33_v5 }
  0x75   :  { %v41_v8 = vpop.permute.xlu0 %40 }
  0x76   :  { %v46_v9 = vmul.f32 %v853_v7, %v41_v8 }
  0x78   :  { %v50_v11 = vadd.f32 %v859_v10, %v46_v9 }
  0x86   :  { %v72_v12 = vpop.f32.mrf.mxu0 }
  0x87   :  { %v75_v13 = vadd.f32 %v72_v12, %v50_v11 }
  0x89   :  { %v695_v14 = vmul.f32 -1.442695, %v75_v13 }
  0x8b   :  { %738 = vpow2.f32 %v695_v14 }
  0x91   :  { %v739_v15 = vpop.eup %738 }
  0x92   :  { %v79_v16 = vadd.f32 1.0, %v739_v15 }
  0x94   :  { %740 = vrcp.f32 %v79_v16  ;;  %v91_v20 = vand.u32 2147483648, %v79_v16  ;;  %v89_v22 = vand.u32 2147483647, %v79_v16  ;;  %vm85_vm1 = vweird.f32 %v79_v16 }
  0x96   :  { %v92_v24 = vor.u32 1.1754944e-38, %v91_v20  ;;  %vm90_vm3 = vcmp.eq.f32.partialorder %v89_v22, 8.507059e+37 }
  0x9a   :  { %v741_v17 = vpop.eup %740 }
  0x9b   :  { %v81_v18 = vmul.f32 %v741_v17, %v79_v16  ;;  %vm86_vm0 = vweird.f32 %v741_v17 }
  0x9c   :  { %vm87_vm2 = vmor %vm85_vm1, %vm86_vm0 }
  0x9d   :  { %v82_v19 = vsub.f32 1.0, %v81_v18 }
  0x9f   :  { %v83_v21 = vmul.f32 %v741_v17, %v82_v19 }
  0xa1   :  { %v84_v23 = vadd.f32 %v741_v17, %v83_v21 }
  0xa3   :  { %v88_v25 = vsel %vm87_vm2, %v741_v17, %v84_v23 }
  0xa4   :  { %v93_v26 = vsel %vm90_vm3, %v92_v24, %v88_v25 }
  0xa5   :  { %v95_v27 = vmul.f32 2.0, %v93_v26  ;;  %v97_v31 = vmul.f32 0.0, %v93_v26 }
  0xa7   :  { %v696_v28 = vadd.f32 -1.0, %v95_v27 }
  0xa9   :  { %99 = vrot.lane.b32.xlu0 %v696_v28, %s788_s1 }
 0x11b   :  { %v100_v29 = vpop.permute.xlu0 %99 }
 0x11c   :  { %v102_v30 = vmul.f32 %v100_v29, %v93_v26  ;;  %v705_v29 = vld [vmem:[%s962_s0 + $0x18] sm:$0xff] }
 0x11e   :  { %104 = vrot.lane.b32.xlu1 %v102_v30, %s789_s2 }
 0x190   :  { %v105_v32 = vpop.permute.xlu1 %104 }
 0x191   :  { %v107_v33 = vadd.f32 %v105_v32, %v97_v31 }
 0x193   :  { %742 = vtanh.f32 %v107_v33 }
 0x199   :  { %v743_v34 = vpop.eup %742 }
 0x19a   :  { %110 = vrot.lane.b32.xlu1 %v743_v34, %s788_s1 }
 0x20c   :  { %v111_v35 = vpop.permute.xlu1 %110 }
 0x20d   :  { %v113_v36 = vmul.f32 %v111_v35, %v93_v26 }
 0x20f   :  { %124 = vrot.lane.b32.xlu2 %v113_v36, %s789_s2 }
 0x217   :  { %118 = vperm.xlu2 %732, %v697_v37  }
 0x269   :  { %v125_v38 = vpop.permute.xlu2 %124 }
 0x26a   :  { %698 = vmatmul.msk.f32.vlgmr.msra.gmra.mxu1 %vm51_vm4, %v125_v38 }
 0x271   :  { %v119_v39 = vpop.permute.xlu2 %118 }
 0x272   :  { %v121_v40 = vmul.f32 %v853_v7, %v119_v39 }
 0x274   :  { %v122_v41 = vadd.f32 %v859_v10, %v121_v40 }
 0x2e7   :  { %v145_v42 = vpop.f32.mrf.mxu1 }
 0x2e8   :  { %v148_v43 = vadd.f32 %v145_v42, %v122_v41 }
 0x2ea   :  { %v699_v44 = vmul.f32 -1.442695, %v148_v43 }
 0x2ec   :  { %744 = vpow2.f32 %v699_v44 }
 0x2f2   :  { %v745_v45 = vpop.eup %744 }
 0x2f3   :  { %v152_v46 = vadd.f32 1.0, %v745_v45 }
 0x2f5   :  { %746 = vrcp.f32 %v152_v46  ;;  %v164_v50 = vand.u32 2147483648, %v152_v46  ;;  %v162_v52 = vand.u32 2147483647, %v152_v46  ;;  %vm158_vm6 = vweird.f32 %v152_v46 }
 0x2f7   :  { %v165_v54 = vor.u32 1.1754944e-38, %v164_v50  ;;  %vm163_vm8 = vcmp.eq.f32.partialorder %v162_v52, 8.507059e+37 }
 0x2fb   :  { %v747_v47 = vpop.eup %746 }
 0x2fc   :  { %v154_v48 = vmul.f32 %v747_v47, %v152_v46  ;;  %vm159_vm5 = vweird.f32 %v747_v47 }
 0x2fd   :  { %vm160_vm7 = vmor %vm158_vm6, %vm159_vm5 }
 0x2fe   :  { %v155_v49 = vsub.f32 1.0, %v154_v48 }
 0x300   :  { %v156_v51 = vmul.f32 %v747_v47, %v155_v49 }
 0x302   :  { %v157_v53 = vadd.f32 %v747_v47, %v156_v51 }
 0x304   :  { %v161_v55 = vsel %vm160_vm7, %v747_v47, %v157_v53 }
 0x305   :  { %v166_v56 = vsel %vm163_vm8, %v165_v54, %v161_v55 }
 0x306   :  { %v168_v57 = vmul.f32 2.0, %v166_v56  ;;  %v170_v61 = vmul.f32 %v166_v56, %v107_v33 }
 0x308   :  { %v700_v58 = vadd.f32 -1.0, %v168_v57 }
 0x30a   :  { %172 = vrot.lane.b32.xlu0 %v700_v58, %s788_s1 }
 0x37c   :  { %v173_v59 = vpop.permute.xlu0 %172 }
 0x37d   :  { %v175_v60 = vmul.f32 %v173_v59, %v166_v56  ;;  %v709_v59 = vld [vmem:[%s962_s0 + $0x20] sm:$0xff] }
 0x37f   :  { %177 = vrot.lane.b32.xlu1 %v175_v60, %s789_s2 }
 0x387   :  { %191 = vperm.xlu1 %733, %v701_v3  }
 0x3f1   :  { %v178_v62 = vpop.permute.xlu1 %177 }
 0x3f2   :  { %v180_v63 = vadd.f32 %v178_v62, %v170_v61 }
 0x3f4   :  { %748 = vtanh.f32 %v180_v63 }
 0x3f9   :  { %v192_v5 = vpop.permute.xlu1 %191 }
 0x3fa   :  { %v749_v0 = vpop.eup %748  ;;  %v194_v6 = vmul.f32 %v853_v7, %v192_v5 }
 0x3fb   :  { %183 = vrot.lane.b32.xlu2 %v749_v0, %s788_s1 }
 0x3fc   :  { %v195_v8 = vadd.f32 %v859_v10, %v194_v6 }
 0x455   :  { %v184_v1 = vpop.permute.xlu2 %183 }
 0x456   :  { %v186_v2 = vmul.f32 %v184_v1, %v166_v56 }
 0x458   :  { %197 = vrot.lane.b32.xlu0 %v186_v2, %s789_s2 }
 0x4ca   :  { %v198_v4 = vpop.permute.xlu0 %197 }
 0x4cb   :  { %702 = vmatmul.msk.f32.vlgmr.msra.gmra.mxu2 %vm51_vm4, %v198_v4 }
 0x54e   :  { %v218_v9 = vpop.f32.mrf.mxu2 }
 0x54f   :  { %v221_v11 = vadd.f32 %v218_v9, %v195_v8 }
 0x551   :  { %v703_v12 = vmul.f32 -1.442695, %v221_v11 }
 0x553   :  { %750 = vpow2.f32 %v703_v12 }
 0x559   :  { %v751_v13 = vpop.eup %750 }
 0x55a   :  { %v225_v14 = vadd.f32 1.0, %v751_v13 }
 0x55c   :  { %752 = vrcp.f32 %v225_v14  ;;  %v237_v18 = vand.u32 2147483648, %v225_v14  ;;  %v235_v20 = vand.u32 2147483647, %v225_v14  ;;  %vm231_vm10 = vweird.f32 %v225_v14 }
 0x55e   :  { %v238_v22 = vor.u32 1.1754944e-38, %v237_v18  ;;  %vm236_vm12 = vcmp.eq.f32.partialorder %v235_v20, 8.507059e+37 }
 0x562   :  { %v753_v15 = vpop.eup %752 }
 0x563   :  { %v227_v16 = vmul.f32 %v753_v15, %v225_v14  ;;  %vm232_vm9 = vweird.f32 %v753_v15 }
 0x564   :  { %vm233_vm11 = vmor %vm231_vm10, %vm232_vm9 }
 0x565   :  { %v228_v17 = vsub.f32 1.0, %v227_v16 }
 0x567   :  { %v229_v19 = vmul.f32 %v753_v15, %v228_v17 }
 0x569   :  { %v230_v21 = vadd.f32 %v753_v15, %v229_v19 }
 0x56b   :  { %v234_v23 = vsel %vm233_vm11, %v753_v15, %v230_v21 }
 0x56c   :  { %v239_v24 = vsel %vm236_vm12, %v238_v22, %v234_v23 }
 0x56d   :  { %v241_v25 = vmul.f32 2.0, %v239_v24  ;;  %v243_v30 = vmul.f32 %v239_v24, %v180_v63 }
 0x56f   :  { %v704_v26 = vadd.f32 -1.0, %v241_v25 }
 0x571   :  { %245 = vrot.lane.b32.xlu2 %v704_v26, %s788_s1 }
 0x5cb   :  { %v246_v27 = vpop.permute.xlu2 %245 }
 0x5cc   :  { %v248_v28 = vmul.f32 %v246_v27, %v239_v24  ;;  %v713_v27 = vld [vmem:[%s962_s0 + $0x28] sm:$0xff] }
 0x5ce   :  { %250 = vrot.lane.b32.xlu0 %v248_v28, %s789_s2 }
 0x5d6   :  { %264 = vperm.xlu0 %731, %v705_v29  }
 0x640   :  { %v251_v31 = vpop.permute.xlu0 %250 }
 0x641   :  { %v253_v32 = vadd.f32 %v251_v31, %v243_v30 }
 0x643   :  { %754 = vtanh.f32 %v253_v32 }
 0x648   :  { %v265_v37 = vpop.permute.xlu0 %264 }
 0x649   :  { %v755_v33 = vpop.eup %754  ;;  %v267_v38 = vmul.f32 %v853_v7, %v265_v37 }
 0x64a   :  { %256 = vrot.lane.b32.xlu1 %v755_v33, %s788_s1 }
 0x64b   :  { %v268_v39 = vadd.f32 %v859_v10, %v267_v38 }
 0x6bc   :  { %v257_v34 = vpop.permute.xlu1 %256 }
 0x6bd   :  { %v259_v35 = vmul.f32 %v257_v34, %v239_v24 }
 0x6bf   :  { %270 = vrot.lane.b32.xlu2 %v259_v35, %s789_s2 }
 0x719   :  { %v271_v36 = vpop.permute.xlu2 %270 }
 0x71a   :  { %706 = vmatmul.msk.f32.vlgmr.msra.gmra.mxu3 %vm51_vm4, %v271_v36 }
 0x79d   :  { %v291_v40 = vpop.f32.mrf.mxu3 }
 0x79e   :  { %v294_v41 = vadd.f32 %v291_v40, %v268_v39 }
 0x7a0   :  { %v707_v42 = vmul.f32 -1.442695, %v294_v41 }
 0x7a2   :  { %756 = vpow2.f32 %v707_v42 }
 0x7a8   :  { %v757_v43 = vpop.eup %756 }
 0x7a9   :  { %v298_v44 = vadd.f32 1.0, %v757_v43 }
 0x7ab   :  { %758 = vrcp.f32 %v298_v44  ;;  %v310_v48 = vand.u32 2147483648, %v298_v44  ;;  %v308_v50 = vand.u32 2147483647, %v298_v44  ;;  %vm304_vm14 = vweird.f32 %v298_v44 }
 0x7ad   :  { %v311_v52 = vor.u32 1.1754944e-38, %v310_v48  ;;  %vm309_vm0 = vcmp.eq.f32.partialorder %v308_v50, 8.507059e+37 }
 0x7b1   :  { %v759_v45 = vpop.eup %758 }
 0x7b2   :  { %v300_v46 = vmul.f32 %v759_v45, %v298_v44  ;;  %vm305_vm13 = vweird.f32 %v759_v45 }
 0x7b3   :  { %vm306_vm15 = vmor %vm304_vm14, %vm305_vm13 }
 0x7b4   :  { %v301_v47 = vsub.f32 1.0, %v300_v46 }
 0x7b6   :  { %v302_v49 = vmul.f32 %v759_v45, %v301_v47 }
 0x7b8   :  { %v303_v51 = vadd.f32 %v759_v45, %v302_v49 }
 0x7ba   :  { %v307_v53 = vsel %vm306_vm15, %v759_v45, %v303_v51 }
 0x7bb   :  { %v312_v54 = vsel %vm309_vm0, %v311_v52, %v307_v53 }
 0x7bc   :  { %v314_v55 = vmul.f32 2.0, %v312_v54  ;;  %v316_v60 = vmul.f32 %v312_v54, %v253_v32 }
 0x7be   :  { %v708_v56 = vadd.f32 -1.0, %v314_v55 }
 0x7c0   :  { %318 = vrot.lane.b32.xlu1 %v708_v56, %s788_s1 }
 0x832   :  { %v319_v57 = vpop.permute.xlu1 %318 }
 0x833   :  { %v321_v58 = vmul.f32 %v319_v57, %v312_v54  ;;  %v717_v57 = vld [vmem:[%s962_s0 + $0x30] sm:$0xff] }
 0x835   :  { %323 = vrot.lane.b32.xlu2 %v321_v58, %s789_s2 }
 0x83d   :  { %337 = vperm.xlu2 %732, %v709_v59  }
 0x88f   :  { %v324_v61 = vpop.permute.xlu2 %323 }
 0x890   :  { %v326_v62 = vadd.f32 %v324_v61, %v316_v60 }
 0x892   :  { %760 = vtanh.f32 %v326_v62 }
 0x897   :  { %v338_v3 = vpop.permute.xlu2 %337 }
 0x898   :  { %v761_v63 = vpop.eup %760  ;;  %v340_v4 = vmul.f32 %v853_v7, %v338_v3 }
 0x899   :  { %329 = vrot.lane.b32.xlu0 %v761_v63, %s788_s1 }
 0x89a   :  { %v341_v5 = vadd.f32 %v859_v10, %v340_v4 }
 0x90b   :  { %v330_v0 = vpop.permute.xlu0 %329 }
 0x90c   :  { %v332_v1 = vmul.f32 %v330_v0, %v312_v54 }
 0x90e   :  { %343 = vrot.lane.b32.xlu1 %v332_v1, %s789_s2 }
 0x980   :  { %v344_v2 = vpop.permute.xlu1 %343 }
 0x981   :  { %710 = vmatmul.msk.f32.vlgmr.msrb.gmra.mxu0 %vm51_vm4, %v344_v2 }
 0x9fe   :  { %v364_v6 = vpop.f32.mrf.mxu0 }
 0x9ff   :  { %v367_v8 = vadd.f32 %v364_v6, %v341_v5 }
 0xa01   :  { %v711_v9 = vmul.f32 -1.442695, %v367_v8 }
 0xa03   :  { %762 = vpow2.f32 %v711_v9 }
 0xa09   :  { %v763_v11 = vpop.eup %762 }
 0xa0a   :  { %v371_v12 = vadd.f32 1.0, %v763_v11 }
 0xa0c   :  { %764 = vrcp.f32 %v371_v12  ;;  %v383_v16 = vand.u32 2147483648, %v371_v12  ;;  %v381_v18 = vand.u32 2147483647, %v371_v12  ;;  %vm377_vm2 = vweird.f32 %v371_v12 }
 0xa0e   :  { %v384_v20 = vor.u32 1.1754944e-38, %v383_v16  ;;  %vm382_vm5 = vcmp.eq.f32.partialorder %v381_v18, 8.507059e+37 }
 0xa12   :  { %v765_v13 = vpop.eup %764 }
 0xa13   :  { %v373_v14 = vmul.f32 %v765_v13, %v371_v12  ;;  %vm378_vm1 = vweird.f32 %v765_v13 }
 0xa14   :  { %vm379_vm3 = vmor %vm377_vm2, %vm378_vm1  ;;  %vm665_vm2 = vcmask 64512  }
 0xa15   :  { %v374_v15 = vsub.f32 1.0, %v373_v14 }
 0xa17   :  { %v375_v17 = vmul.f32 %v765_v13, %v374_v15 }
 0xa19   :  { %v376_v19 = vadd.f32 %v765_v13, %v375_v17 }
 0xa1b   :  { %v380_v21 = vsel %vm379_vm3, %v765_v13, %v376_v19  ;;  %vm689_vm3 = vcmask 7168  }
 0xa1c   :  { %v385_v22 = vsel %vm382_vm5, %v384_v20, %v380_v21 }
 0xa1d   :  { %v387_v23 = vmul.f32 2.0, %v385_v22  ;;  %v389_v28 = vmul.f32 %v385_v22, %v326_v62 }
 0xa1f   :  { %v712_v24 = vadd.f32 -1.0, %v387_v23 }
 0xa21   :  { %391 = vrot.lane.b32.xlu0 %v712_v24, %s788_s1 }
 0xa93   :  { %v392_v25 = vpop.permute.xlu0 %391 }
 0xa94   :  { %v394_v26 = vmul.f32 %v392_v25, %v385_v22  ;;  %v721_v25 = vld [vmem:[%s962_s0 + $0x38] sm:$0xff] }
 0xa96   :  { %396 = vrot.lane.b32.xlu1 %v394_v26, %s789_s2 }
 0xa9e   :  { %410 = vperm.xlu1 %733, %v713_v27  }
 0xb08   :  { %v397_v29 = vpop.permute.xlu1 %396 }
 0xb09   :  { %v399_v30 = vadd.f32 %v397_v29, %v389_v28 }
 0xb0b   :  { %766 = vtanh.f32 %v399_v30 }
 0xb10   :  { %v411_v35 = vpop.permute.xlu1 %410 }
 0xb11   :  { %v767_v31 = vpop.eup %766  ;;  %v413_v36 = vmul.f32 %v853_v7, %v411_v35 }
 0xb12   :  { %402 = vrot.lane.b32.xlu2 %v767_v31, %s788_s1 }
 0xb13   :  { %v414_v37 = vadd.f32 %v859_v10, %v413_v36 }
 0xb6c   :  { %v403_v32 = vpop.permute.xlu2 %402 }
 0xb6d   :  { %v405_v33 = vmul.f32 %v403_v32, %v385_v22 }
 0xb6f   :  { %416 = vrot.lane.b32.xlu0 %v405_v33, %s789_s2 }
 0xbe1   :  { %v417_v34 = vpop.permute.xlu0 %416 }
 0xbe2   :  { %714 = vmatmul.msk.f32.vlgmr.msrb.gmra.mxu1 %vm51_vm4, %v417_v34 }
 0xc5f   :  { %v437_v38 = vpop.f32.mrf.mxu1 }
 0xc60   :  { %v440_v39 = vadd.f32 %v437_v38, %v414_v37 }
 0xc62   :  { %v715_v40 = vmul.f32 -1.442695, %v440_v39 }
 0xc64   :  { %768 = vpow2.f32 %v715_v40 }
 0xc6a   :  { %v769_v41 = vpop.eup %768 }
 0xc6b   :  { %v444_v42 = vadd.f32 1.0, %v769_v41 }
 0xc6d   :  { %770 = vrcp.f32 %v444_v42  ;;  %v456_v46 = vand.u32 2147483648, %v444_v42  ;;  %v454_v48 = vand.u32 2147483647, %v444_v42  ;;  %vm450_vm7 = vweird.f32 %v444_v42 }
 0xc6f   :  { %v457_v50 = vor.u32 1.1754944e-38, %v456_v46  ;;  %vm455_vm9 = vcmp.eq.f32.partialorder %v454_v48, 8.507059e+37 }
 0xc73   :  { %v771_v43 = vpop.eup %770 }
 0xc74   :  { %v446_v44 = vmul.f32 %v771_v43, %v444_v42  ;;  %vm451_vm6 = vweird.f32 %v771_v43 }
 0xc75   :  { %vm452_vm8 = vmor %vm450_vm7, %vm451_vm6 }
 0xc76   :  { %v447_v45 = vsub.f32 1.0, %v446_v44 }
 0xc78   :  { %v448_v47 = vmul.f32 %v771_v43, %v447_v45 }
 0xc7a   :  { %v449_v49 = vadd.f32 %v771_v43, %v448_v47 }
 0xc7c   :  { %v453_v51 = vsel %vm452_vm8, %v771_v43, %v449_v49 }
 0xc7d   :  { %v458_v52 = vsel %vm455_vm9, %v457_v50, %v453_v51 }
 0xc7e   :  { %v460_v53 = vmul.f32 2.0, %v458_v52  ;;  %v462_v58 = vmul.f32 %v458_v52, %v399_v30 }
 0xc80   :  { %v716_v54 = vadd.f32 -1.0, %v460_v53 }
 0xc82   :  { %464 = vrot.lane.b32.xlu2 %v716_v54, %s788_s1 }
 0xcdc   :  { %v465_v55 = vpop.permute.xlu2 %464 }
 0xcdd   :  { %v467_v56 = vmul.f32 %v465_v55, %v458_v52 }
 0xcdf   :  { %469 = vrot.lane.b32.xlu0 %v467_v56, %s789_s2 }
 0xce7   :  { %483 = vperm.xlu0 %731, %v717_v57   ;;  %v629_v57 = vld [vmem:[%s965_s4 + $0x18] sm:$0xff] }
 0xce8   :  { %651 = vmatpush.msra.mxu0 %v629_v57 }
 0xd51   :  { %v470_v59 = vpop.permute.xlu0 %469 }
 0xd52   :  { %v472_v60 = vadd.f32 %v470_v59, %v462_v58  ;;  %v628_v58 = vld [vmem:[%s965_s4 + $0x10] sm:$0xff]  ;;  %v627_v59 = vld [vmem:[%s965_s4 + $0x8] sm:$0xff] }
 0xd53   :  { %652 = vmatpush.msra.mxu0 %v628_v58 }
 0xd54   :  { %772 = vtanh.f32 %v472_v60 }
 0xd55   :  { %653 = vmatpush.msra.mxu0 %v627_v59 }
 0xd59   :  { %v484_v1 = vpop.permute.xlu0 %483 }
 0xd5a   :  { %v773_v61 = vpop.eup %772  ;;  %v486_v2 = vmul.f32 %v853_v7, %v484_v1 }
 0xd5b   :  { %475 = vrot.lane.b32.xlu1 %v773_v61, %s788_s1 }
 0xd5c   :  { %v487_v3 = vadd.f32 %v859_v10, %v486_v2  ;;  %v13_v2 = vstv %s968_s7 }
 0xd5d   :  { %14 = vst [vmem:[#allocation2] sm:$0x1] %v13_v2 }
 0xdcd   :  { %v476_v62 = vpop.permute.xlu1 %475 }
 0xdce   :  { %v478_v63 = vmul.f32 %v476_v62, %v458_v52 }
 0xdd0   :  { %489 = vrot.lane.b32.xlu2 %v478_v63, %s789_s2 }
 0xe2a   :  { %v490_v0 = vpop.permute.xlu2 %489 }
 0xe2b   :  { %718 = vmatmul.msk.f32.vlgmr.msrb.gmra.mxu2 %vm51_vm4, %v490_v0  ;;  %v660_v0 = vld [vmem:[%s967_s6] sm:$0xff] }
 0xe2c   :  { %684 = vmatpush.msra.mxu1 %v660_v0 }
 0xeae   :  { %v510_v4 = vpop.f32.mrf.mxu2 }
 0xeaf   :  { %v513_v5 = vadd.f32 %v510_v4, %v487_v3  ;;  %v736_v3 = vld [vmem:[%s966_s5] ss:$0 sm:$0xff] }
 0xeb1   :  { %v719_v6 = vmul.f32 -1.442695, %v513_v5 }
 0xeb3   :  { %774 = vpow2.f32 %v719_v6 }
 0xeb9   :  { %v775_v8 = vpop.eup %774 }
 0xeba   :  { %v517_v9 = vadd.f32 1.0, %v775_v8  ;;  %v737_v8 = vld [vmem:[#allocation2] ss:$0 sm:$0xff] }
 0xebc   :  { %776 = vrcp.f32 %v517_v9  ;;  %v529_v14 = vand.u32 2147483648, %v517_v9  ;;  %v527_v16 = vand.u32 2147483647, %v517_v9  ;;  %vm523_vm11 = vweird.f32 %v517_v9 }
 0xebe   :  { %v530_v18 = vor.u32 1.1754944e-38, %v529_v14  ;;  %vm528_vm13 = vcmp.eq.f32.partialorder %v527_v16, 8.507059e+37 }
 0xec2   :  { %v777_v11 = vpop.eup %776 }
 0xec3   :  { %v519_v12 = vmul.f32 %v777_v11, %v517_v9  ;;  %vm524_vm10 = vweird.f32 %v777_v11 }
 0xec4   :  { %vm525_vm12 = vmor %vm523_vm11, %vm524_vm10 }
 0xec5   :  { %v520_v13 = vsub.f32 1.0, %v519_v12 }
 0xec7   :  { %v521_v15 = vmul.f32 %v777_v11, %v520_v13 }
 0xec9   :  { %v522_v17 = vadd.f32 %v777_v11, %v521_v15 }
 0xecb   :  { %v526_v19 = vsel %vm525_vm12, %v777_v11, %v522_v17 }
 0xecc   :  { %v531_v20 = vsel %vm528_vm13, %v530_v18, %v526_v19 }
 0xecd   :  { %v533_v21 = vmul.f32 2.0, %v531_v20  ;;  %v535_v26 = vmul.f32 %v531_v20, %v472_v60  ;;  %v626_v60 = vld [vmem:[%s965_s4] sm:$0xff] }
 0xece   :  { %654 = vmatpush.msra.mxu0 %v626_v60 }
 0xecf   :  { %v720_v22 = vadd.f32 -1.0, %v533_v21 }
 0xed1   :  { %537 = vrot.lane.b32.xlu1 %v720_v22, %s788_s1 }
 0xf43   :  { %v538_v23 = vpop.permute.xlu1 %537 }
 0xf44   :  { %v540_v24 = vmul.f32 %v538_v23, %v531_v20 }
 0xf46   :  { %542 = vrot.lane.b32.xlu2 %v540_v24, %s789_s2 }
 0xf4e   :  { %556 = vperm.xlu2 %732, %v721_v25  }
 0xfa0   :  { %v543_v27 = vpop.permute.xlu2 %542 }
 0xfa1   :  { %v545_v28 = vadd.f32 %v543_v27, %v535_v26 }
 0xfa3   :  { %778 = vtanh.f32 %v545_v28 }
 0xfa8   :  { %v557_v33 = vpop.permute.xlu2 %556 }
 0xfa9   :  { %v779_v29 = vpop.eup %778  ;;  %v559_v34 = vmul.f32 %v853_v7, %v557_v33 }
 0xfaa   :  { %548 = vrot.lane.b32.xlu0 %v779_v29, %s788_s1 }
 0xfab   :  { %v560_v35 = vadd.f32 %v859_v10, %v559_v34 }
0x101c   :  { %v549_v30 = vpop.permute.xlu0 %548 }
0x101d   :  { %v551_v31 = vmul.f32 %v549_v30, %v531_v20 }
0x101f   :  { %562 = vrot.lane.b32.xlu1 %v551_v31, %s789_s2 }
0x1091   :  { %v563_v32 = vpop.permute.xlu1 %562 }
0x1092   :  { %722 = vmatmul.msk.f32.vlgmr.msrb.gmra.mxu3 %vm51_vm4, %v563_v32 }
0x1115   :  { %v583_v36 = vpop.f32.mrf.mxu3 }
0x1116   :  { %v586_v37 = vadd.f32 %v583_v36, %v560_v35 }
0x1118   :  { %v723_v38 = vmul.f32 -1.442695, %v586_v37 }
0x111a   :  { %780 = vpow2.f32 %v723_v38 }
0x1120   :  { %v781_v39 = vpop.eup %780 }
0x1121   :  { %v590_v40 = vadd.f32 1.0, %v781_v39 }
0x1123   :  { %782 = vrcp.f32 %v590_v40  ;;  %v602_v44 = vand.u32 2147483648, %v590_v40  ;;  %v600_v46 = vand.u32 2147483647, %v590_v40  ;;  %vm596_vm15 = vweird.f32 %v590_v40 }
0x1125   :  { %v603_v7 = vor.u32 1.1754944e-38, %v602_v44  ;;  %vm601_vm1 = vcmp.eq.f32.partialorder %v600_v46, 8.507059e+37 }
0x1129   :  { %v783_v41 = vpop.eup %782 }
0x112a   :  { %v592_v42 = vmul.f32 %v783_v41, %v590_v40  ;;  %vm597_vm14 = vweird.f32 %v783_v41 }
0x112b   :  { %vm598_vm0 = vmor %vm596_vm15, %vm597_vm14 }
0x112c   :  { %v593_v43 = vsub.f32 1.0, %v592_v42 }
0x112e   :  { %v594_v45 = vmul.f32 %v783_v41, %v593_v43 }
0x1130   :  { %v595_v47 = vadd.f32 %v783_v41, %v594_v45 }
0x1132   :  { %v599_v48 = vsel %vm598_vm0, %v783_v41, %v595_v47 }
0x1133   :  { %v604_v10 = vsel %vm601_vm1, %v603_v7, %v599_v48 }
0x1134   :  { %v606_v49 = vmul.f32 2.0, %v604_v10  ;;  %v608_v53 = vmul.f32 %v604_v10, %v545_v28 }
0x1136   :  { %v724_v50 = vadd.f32 -1.0, %v606_v49 }
0x1138   :  { %610 = vrot.lane.b32.xlu0 %v724_v50, %s788_s1 }
0x11aa   :  { %v611_v51 = vpop.permute.xlu0 %610 }
0x11ab   :  { %v613_v52 = vmul.f32 %v611_v51, %v604_v10 }
0x11ad   :  { %615 = vrot.lane.b32.xlu1 %v613_v52, %s789_s2 }
0x121f   :  { %v616_v54 = vpop.permute.xlu1 %615 }
0x1220   :  { %v618_v55 = vadd.f32 %v616_v54, %v608_v53 }
0x1222   :  { %784 = vtanh.f32 %v618_v55 }
0x1228   :  { %v785_v56 = vpop.eup %784 }
0x1229   :  { %621 = vrot.lane.b32.xlu2 %v785_v56, %s788_s1 }
0x1283   :  { %v622_v61 = vpop.permute.xlu2 %621 }
0x1284   :  { %v624_v62 = vmul.f32 %v622_v61, %v604_v10 }
0x1286   :  { %v625_v63 = vmax.f32 %v624_v62, 0.0 }
0x1288   :  { %635 = vrot.lane.b32.xlu0 %v625_v63, %s789_s2 }
0x12fa   :  { %v636_v1 = vpop.permute.xlu0 %635 }
0x12fb   :  { %725 = vmatmul.msk.f32.vlgmr.msra.gmra.mxu0 %vm51_vm4, %v636_v1 }
0x1378   :  { %v656_v4 = vpop.f32.mrf.mxu0 }
0x1379   :  { %v657_v5 = vadd.f32 %v736_v3, %v656_v4 }
0x137b   :  { %v659_v6 = vmax.f32 %v657_v5, 0.0 }
0x137d   :  { %726 = vmatmul.msk.f32.vlgmr.msra.gmra.mxu1 %vm665_vm2, %v659_v6 }
0x13fa   :  { %v686_v9 = vpop.f32.mrf.mxu1 }
0x13fb   :  { %v687_v11 = vadd.f32 %v737_v8, %v686_v9 }
0x13fd   :  { %690 = vst.msk [vmem:[%s969_s8] sm:$0xff] %vm689_vm3, %v687_v11 }

</bundles_post_ra>
